<compile_context>
chip_gen: v6e
topology: v6e:2x2x1
jax: 0.10.0
libtpu: 0.0.40
codegen_flags: <defaults>
</compile_context>

<pallas_src>
import functools

import jax
import jax.numpy as jnp
from jax import lax
from jax.experimental import pallas as pl
from jax.experimental.pallas import tpu as pltpu

_LANE = 128


def _sublane_multiple(dtype):
    # f32 -> 8, bf16/f16 -> 16, int8/fp8 -> 32 sublanes per native tile.
    return max(8, 32 // jnp.dtype(dtype).itemsize)


def _soft_dice_kernel(x_ref, y_ref, tp_ref, sx_ref, sy_ref, *,
                      ts, nk_per, nk_total, last_tile_cols, unroll):
    """Accumulate lane-wide running sums tp=sum(x*y), sx=sum(x), sy=sum(y).

    Grid = (row_blocks, spatial_splits, k).  tp/sx/sy are (row_block, 128)
    f32 accumulators resident in VMEM across the k (reduction) axis.
    """
    p = pl.program_id(1)
    k = pl.program_id(2)

    @pl.when(k == 0)
    def _():
        tp_ref[...] = jnp.zeros_like(tp_ref)
        sx_ref[...] = jnp.zeros_like(sx_ref)
        sy_ref[...] = jnp.zeros_like(sy_ref)

    n_full = ts // _LANE                    # 128-lane chunks in a full tile
    full_last = last_tile_cols // _LANE     # full chunks in the last tile
    tail_lanes = last_tile_cols % _LANE     # masked lanes in the last tile
    has_ragged = last_tile_cols != ts       # static Python bool

    def accum(j, carry):
        tp, sx, sy = carry
        off = pl.multiple_of(j * _LANE, _LANE)
        xv = x_ref[:, pl.ds(off, _LANE)].astype(jnp.float32)
        yv = y_ref[:, pl.ds(off, _LANE)].astype(jnp.float32)
        return (tp + xv * yv, sx + xv, sy + yv)

    def run_full_tile():
        acc0 = (tp_ref[...], sx_ref[...], sy_ref[...])
        tp, sx, sy = lax.fori_loop(0, n_full, accum, acc0,
                                   unroll=min(unroll, n_full))
        tp_ref[...] = tp
        sx_ref[...] = sx
        sy_ref[...] = sy

    if not has_ragged:
        # Every tile is dense: no mask, no iota anywhere in the hot loop.
        run_full_tile()
    else:
        gk = p * nk_per + k                 # global spatial tile index
        is_last = gk == nk_total - 1

        @pl.when(jnp.logical_not(is_last))
        def _():
            run_full_tile()

        @pl.when(is_last)
        def _():
            tp = tp_ref[...]
            sx = sx_ref[...]
            sy = sy_ref[...]
            if full_last > 0:
                tp, sx, sy = lax.fori_loop(0, full_last, accum, (tp, sx, sy),
                                           unroll=min(unroll, full_last))
            if tail_lanes > 0:
                # Single masked tail chunk; columns beyond S in this VMEM
                # block hold garbage and are zeroed before any arithmetic.
                off = full_last * _LANE
                xv = x_ref[:, pl.ds(off, _LANE)].astype(jnp.float32)
                yv = y_ref[:, pl.ds(off, _LANE)].astype(jnp.float32)
                lane = lax.broadcasted_iota(jnp.int32, xv.shape, 1)
                valid = lane < tail_lanes
                xv = jnp.where(valid, xv, 0.0)
                yv = jnp.where(valid, yv, 0.0)
                tp = tp + xv * yv
                sx = sx + xv
                sy = sy + yv
            tp_ref[...] = tp
            sx_ref[...] = sx
            sy_ref[...] = sy


def soft_dice_loss(x, y, *, smooth=1.0):
    """SoftDiceLoss forward (batch_dice=False, do_bg=True, apply_nonlin=None).

    x, y: (b, c, h, w), y one-hot / same shape as x.  Any float/int dtype
    (bf16/int8 inputs halve HBM traffic); accumulation is float32 in-kernel.
    """
    b, c, h, w = x.shape
    assert y.shape == x.shape
    n = b * c
    s = h * w

    # Pure reshape: no pad / cast HBM passes in the wrapper.
    x2 = x.reshape(n, s)
    y2 = y.reshape(n, s)

    # ---- row blocking: small sublane blocks bound vreg pressure -------------
    gran = max(_sublane_multiple(x2.dtype), _sublane_multiple(y2.dtype))
    row_block = None
    for cand in (32, 16, 8):
        if cand % gran == 0 and n % cand == 0:
            row_block = cand
            break
    if row_block is None:
        # TODO(synk): n not divisible by the dtype sublane granularity; fall
        # back to one full-row block (fine for typical small b*c).
        row_block = n
    n_row_blocks = n // row_block

    # ---- spatial tile: ~4 MiB per input block, keep >=4 pipeline steps ------
    itemsize_pair = x2.dtype.itemsize + y2.dtype.itemsize
    per_buffer_cap = 4 * 1024 * 1024
    ts_cap = max(
        _LANE,
        (per_buffer_cap // (row_block * max(x2.dtype.itemsize,
                                            y2.dtype.itemsize)))
        // _LANE * _LANE)
    s_lanes = pl.cdiv(s, _LANE) * _LANE
    ts = min(ts_cap, 2048, s_lanes)
    if s_lanes >= 2048 and pl.cdiv(s, ts) < 4:
        ts = min(s_lanes, max(512, pl.cdiv(pl.cdiv(s, 4), _LANE) * _LANE))
    nk = pl.cdiv(s, ts)

    # ---- spatial split across TensorCores (2 on v7x; harmless on v5e/v6e) ---
    if nk >= 8 and nk % 2 == 1:
        ts_alt = pl.cdiv(pl.cdiv(s, nk + 1), _LANE) * _LANE
        if (ts_alt >= _LANE and pl.cdiv(s, ts_alt) >= 8
                and pl.cdiv(s, ts_alt) % 2 == 0):
            ts = ts_alt
            nk = pl.cdiv(s, ts)
    n_splits = 2 if (nk >= 8 and nk % 2 == 0) else 1
    nk_per = nk // n_splits

    last_tile_cols = s - (nk - 1) * ts

    # ---- unroll sized to the 64-entry vreg file ------------------------------
    rows8 = max(1, pl.cdiv(row_block, 8))
    unroll = max(1, min(8, 40 // (2 * rows8)))

    kernel = functools.partial(
        _soft_dice_kernel, ts=ts, nk_per=nk_per, nk_total=nk,
        last_tile_cols=last_tile_cols, unroll=unroll)

    acc_shape = jax.ShapeDtypeStruct((n_splits, n, _LANE), jnp.float32)
    in_spec = pl.BlockSpec((row_block, ts),
                           lambda i, p, k: (i, p * nk_per + k))
    out_spec = pl.BlockSpec((None, row_block, _LANE),
                            lambda i, p, k: (p, i, 0))

    # VMEM budget: 2 inputs x double buffer + resident accumulators + margin,
    # capped at 75% of the smallest per-TensorCore VMEM (v7x: 64 MiB).
    in_block_bytes = row_block * ts * itemsize_pair
    needed = 2 * in_block_bytes + 2 * (3 * row_block * _LANE * 4) + (4 << 20)
    vmem_limit = int(min(48 << 20, max(32 << 20, needed)))

    cost = pl.CostEstimate(
        flops=4 * n * s,
        transcendentals=0,
        bytes_accessed=n * s * itemsize_pair + 3 * n_splits * n * _LANE * 4)

    tp_w, sx_w, sy_w = pl.pallas_call(
        kernel,
        out_shape=(acc_shape, acc_shape, acc_shape),
        grid_spec=pltpu.PrefetchScalarGridSpec(
            num_scalar_prefetch=0,
            grid=(n_row_blocks, n_splits, nk_per),
            in_specs=[in_spec, in_spec],
            out_specs=[out_spec, out_spec, out_spec],
        ),
        compiler_params=pltpu.CompilerParams(
            dimension_semantics=("parallel", "parallel", "arbitrary"),
            vmem_limit_bytes=vmem_limit,
        ),
        cost_estimate=cost,
    )(x2, y2)

    # Tiny JAX epilogue on (n_splits, n, 128)-sized partials.
    tp = jnp.sum(tp_w, axis=(0, 2))
    sx = jnp.sum(sx_w, axis=(0, 2))
    sy = jnp.sum(sy_w, axis=(0, 2))
    fp = sx - tp
    fn = sy - tp
    nominator = 2.0 * tp + smooth
    denominator = 2.0 * tp + fp + fn + smooth
    dc = nominator / (denominator + 1e-8)
    return 1.0 - jnp.mean(dc)


def soft_dice_loss_ref(x, y, smooth=1.0):
    # Pure-JAX reference mirroring the PyTorch forward
    # (batch_dice=False, do_bg=True, apply_nonlin=None, loss_mask=None).
    xf = x.astype(jnp.float32)
    yf = y.astype(jnp.float32)
    axes = (2, 3)
    tp = jnp.sum(xf * yf, axis=axes)
    fp = jnp.sum(xf * (1.0 - yf), axis=axes)
    fn = jnp.sum((1.0 - xf) * yf, axis=axes)
    nominator = 2.0 * tp + smooth
    denominator = 2.0 * tp + fp + fn + smooth
    dc = nominator / (denominator + 1e-8)
    return 1.0 - jnp.mean(dc)


if __name__ == "__main__":
    key = jax.random.PRNGKey(0)
    kx, ky = jax.random.split(key)

    B, C, H, W = 2, 4, 16, 16
    # Predictions in [0, 1] (e.g. post-softmax probabilities).
    logits = jax.random.normal(kx, (B, C, H, W), dtype=jnp.float32)
    x = jax.nn.softmax(logits, axis=1)
    # Ground truth: one-hot label map with the same shape as x.
    labels = jax.random.randint(ky, (B, H, W), 0, C)
    y = jax.nn.one_hot(labels, C, dtype=jnp.float32).transpose(0, 3, 1, 2)

    loss = jax.block_until_ready(soft_dice_loss(x, y, smooth=1.0))
    ref = jax.block_until_ready(soft_dice_loss_ref(x, y, smooth=1.0))

    assert jnp.allclose(loss, ref, rtol=1e-5, atol=1e-5), (loss, ref)
    print("KERNEL_OK")
</pallas_src>

<mosaic_0001>
module attributes {stable_mosaic.version = 11 : i64} {
  func.func @_soft_dice_kernel(%arg0: i32, %arg1: i32, %arg2: i32, %arg3: memref<8x256xf32, #tpu.memory_space<vmem>>, %arg4: memref<8x256xf32, #tpu.memory_space<vmem>>, %arg5: memref<1x8x128xf32, #tpu.memory_space<vmem>>, %arg6: memref<1x8x128xf32, #tpu.memory_space<vmem>>, %arg7: memref<1x8x128xf32, #tpu.memory_space<vmem>>) attributes {dimension_semantics = [#tpu.dimension_semantics<parallel>, #tpu.dimension_semantics<parallel>, #tpu.dimension_semantics<arbitrary>], iteration_bounds = array<i64: 1, 1, 1>, scalar_prefetch = 0 : i64, scratch_operands = 0 : i64, tpu.core_type = #tpu.core_type<tc>, window_params = [{transform_indices = @transform_0, window_bounds = array<i64: 8, 256>}, {transform_indices = @transform_1, window_bounds = array<i64: 8, 256>}, {transform_indices = @transform_2, window_bounds = array<i64: 1, 8, 128>}, {transform_indices = @transform_3, window_bounds = array<i64: 1, 8, 128>}, {transform_indices = @transform_4, window_bounds = array<i64: 1, 8, 128>}]} {
    %c0_i32 = arith.constant 0 : i32
    %0 = arith.cmpi eq, %arg2, %c0_i32 : i32
    %1 = arith.extui %0 : i1 to i32
    %c0_i32_0 = arith.constant 0 : i32
    %2 = arith.cmpi ne, %1, %c0_i32_0 : i32
    scf.if %2 {
      %cst = arith.constant 0.000000e+00 : f32
      %38 = vector.broadcast %cst : f32 to vector<8x128xf32>
      %c0_24 = arith.constant 0 : index
      %c0_25 = arith.constant 0 : index
      %c0_26 = arith.constant 0 : index
      %39 = vector.load %arg5[%c0_24, %c0_25, %c0_26] : memref<1x8x128xf32, #tpu.memory_space<vmem>>, vector<1x8x128xf32>
      %40 = vector.shape_cast %39 : vector<1x8x128xf32> to vector<8x128xf32>
      %41 = vector.shape_cast %38 : vector<8x128xf32> to vector<1x8x128xf32>
      tpu.vector_store %arg5[%c0_24, %c0_25, %c0_26], %41 {strides = array<i32>} : memref<1x8x128xf32, #tpu.memory_space<vmem>>, vector<1x8x128xf32>,
      %cst_27 = arith.constant 0.000000e+00 : f32
      %42 = vector.broadcast %cst_27 : f32 to vector<8x128xf32>
      %c0_28 = arith.constant 0 : index
      %c0_29 = arith.constant 0 : index
      %c0_30 = arith.constant 0 : index
      %43 = vector.load %arg6[%c0_28, %c0_29, %c0_30] : memref<1x8x128xf32, #tpu.memory_space<vmem>>, vector<1x8x128xf32>
      %44 = vector.shape_cast %43 : vector<1x8x128xf32> to vector<8x128xf32>
      %45 = vector.shape_cast %42 : vector<8x128xf32> to vector<1x8x128xf32>
      tpu.vector_store %arg6[%c0_28, %c0_29, %c0_30], %45 {strides = array<i32>} : memref<1x8x128xf32, #tpu.memory_space<vmem>>, vector<1x8x128xf32>,
      %cst_31 = arith.constant 0.000000e+00 : f32
      %46 = vector.broadcast %cst_31 : f32 to vector<8x128xf32>
      %c0_32 = arith.constant 0 : index
      %c0_33 = arith.constant 0 : index
      %c0_34 = arith.constant 0 : index
      %47 = vector.load %arg7[%c0_32, %c0_33, %c0_34] : memref<1x8x128xf32, #tpu.memory_space<vmem>>, vector<1x8x128xf32>
      %48 = vector.shape_cast %47 : vector<1x8x128xf32> to vector<8x128xf32>
      %49 = vector.shape_cast %46 : vector<8x128xf32> to vector<1x8x128xf32>
      tpu.vector_store %arg7[%c0_32, %c0_33, %c0_34], %49 {strides = array<i32>} : memref<1x8x128xf32, #tpu.memory_space<vmem>>, vector<1x8x128xf32>,
    } else {
    }
    %c0 = arith.constant 0 : index
    %c0_1 = arith.constant 0 : index
    %c0_2 = arith.constant 0 : index
    %3 = vector.load %arg5[%c0, %c0_1, %c0_2] : memref<1x8x128xf32, #tpu.memory_space<vmem>>, vector<1x8x128xf32>
    %4 = vector.shape_cast %3 : vector<1x8x128xf32> to vector<8x128xf32>
    %c0_3 = arith.constant 0 : index
    %c0_4 = arith.constant 0 : index
    %c0_5 = arith.constant 0 : index
    %5 = vector.load %arg6[%c0_3, %c0_4, %c0_5] : memref<1x8x128xf32, #tpu.memory_space<vmem>>, vector<1x8x128xf32>
    %6 = vector.shape_cast %5 : vector<1x8x128xf32> to vector<8x128xf32>
    %c0_6 = arith.constant 0 : index
    %c0_7 = arith.constant 0 : index
    %c0_8 = arith.constant 0 : index
    %7 = vector.load %arg7[%c0_6, %c0_7, %c0_8] : memref<1x8x128xf32, #tpu.memory_space<vmem>>, vector<1x8x128xf32>
    %8 = vector.shape_cast %7 : vector<1x8x128xf32> to vector<8x128xf32>
    %c0_i32_9 = arith.constant 0 : i32
    %c128_i32 = arith.constant 128 : i32
    %9 = arith.muli %c0_i32_9, %c128_i32 : i32
    %10 = tpu.assume_multiple %9, 128 : i32
    %c0_10 = arith.constant 0 : index
    %11 = arith.index_cast %10 : i32 to index
    %12 = vector.load %arg3[%c0_10, %11] : memref<8x256xf32, #tpu.memory_space<vmem>>, vector<8x128xf32>
    %c0_11 = arith.constant 0 : index
    %13 = arith.index_cast %10 : i32 to index
    %14 = vector.load %arg4[%c0_11, %13] : memref<8x256xf32, #tpu.memory_space<vmem>>, vector<8x128xf32>
    %15 = arith.mulf %12, %14 : vector<8x128xf32>
    %16 = arith.addf %4, %15 : vector<8x128xf32>
    %17 = arith.addf %6, %12 : vector<8x128xf32>
    %18 = arith.addf %8, %14 : vector<8x128xf32>
    %c1_i32 = arith.constant 1 : i32
    %c128_i32_12 = arith.constant 128 : i32
    %19 = arith.muli %c1_i32, %c128_i32_12 : i32
    %20 = tpu.assume_multiple %19, 128 : i32
    %c0_13 = arith.constant 0 : index
    %21 = arith.index_cast %20 : i32 to index
    %22 = vector.load %arg3[%c0_13, %21] : memref<8x256xf32, #tpu.memory_space<vmem>>, vector<8x128xf32>
    %c0_14 = arith.constant 0 : index
    %23 = arith.index_cast %20 : i32 to index
    %24 = vector.load %arg4[%c0_14, %23] : memref<8x256xf32, #tpu.memory_space<vmem>>, vector<8x128xf32>
    %25 = arith.mulf %22, %24 : vector<8x128xf32>
    %26 = arith.addf %16, %25 : vector<8x128xf32>
    %27 = arith.addf %17, %22 : vector<8x128xf32>
    %28 = arith.addf %18, %24 : vector<8x128xf32>
    %c2_i32 = arith.constant 2 : i32
    %c0_15 = arith.constant 0 : index
    %c0_16 = arith.constant 0 : index
    %c0_17 = arith.constant 0 : index
    %29 = vector.load %arg5[%c0_15, %c0_16, %c0_17] : memref<1x8x128xf32, #tpu.memory_space<vmem>>, vector<1x8x128xf32>
    %30 = vector.shape_cast %29 : vector<1x8x128xf32> to vector<8x128xf32>
    %31 = vector.shape_cast %26 : vector<8x128xf32> to vector<1x8x128xf32>
    tpu.vector_store %arg5[%c0_15, %c0_16, %c0_17], %31 {strides = array<i32>} : memref<1x8x128xf32, #tpu.memory_space<vmem>>, vector<1x8x128xf32>,
    %c0_18 = arith.constant 0 : index
    %c0_19 = arith.constant 0 : index
    %c0_20 = arith.constant 0 : index
    %32 = vector.load %arg6[%c0_18, %c0_19, %c0_20] : memref<1x8x128xf32, #tpu.memory_space<vmem>>, vector<1x8x128xf32>
    %33 = vector.shape_cast %32 : vector<1x8x128xf32> to vector<8x128xf32>
    %34 = vector.shape_cast %27 : vector<8x128xf32> to vector<1x8x128xf32>
    tpu.vector_store %arg6[%c0_18, %c0_19, %c0_20], %34 {strides = array<i32>} : memref<1x8x128xf32, #tpu.memory_space<vmem>>, vector<1x8x128xf32>,
    %c0_21 = arith.constant 0 : index
    %c0_22 = arith.constant 0 : index
    %c0_23 = arith.constant 0 : index
    %35 = vector.load %arg7[%c0_21, %c0_22, %c0_23] : memref<1x8x128xf32, #tpu.memory_space<vmem>>, vector<1x8x128xf32>
    %36 = vector.shape_cast %35 : vector<1x8x128xf32> to vector<8x128xf32>
    %37 = vector.shape_cast %28 : vector<8x128xf32> to vector<1x8x128xf32>
    tpu.vector_store %arg7[%c0_21, %c0_22, %c0_23], %37 {strides = array<i32>} : memref<1x8x128xf32, #tpu.memory_space<vmem>>, vector<1x8x128xf32>,
    return
  }
  func.func @transform_0(%arg0: i32, %arg1: i32, %arg2: i32) -> (i32, i32) {
    %c1_i32 = arith.constant 1 : i32
    %0 = arith.muli %arg1, %c1_i32 : i32
    %1 = arith.addi %0, %arg2 : i32
    %c0_i32 = arith.constant 0 : i32
    return %arg0, %1 : i32, i32
  }
  func.func @transform_1(%arg0: i32, %arg1: i32, %arg2: i32) -> (i32, i32) {
    %c1_i32 = arith.constant 1 : i32
    %0 = arith.muli %arg1, %c1_i32 : i32
    %1 = arith.addi %0, %arg2 : i32
    %c0_i32 = arith.constant 0 : i32
    return %arg0, %1 : i32, i32
  }
  func.func @transform_2(%arg0: i32, %arg1: i32, %arg2: i32) -> (i32, i32, i32) {
    %c0_i32 = arith.constant 0 : i32
    %c0_i32_0 = arith.constant 0 : i32
    return %arg1, %arg0, %c0_i32 : i32, i32, i32
  }
  func.func @transform_3(%arg0: i32, %arg1: i32, %arg2: i32) -> (i32, i32, i32) {
    %c0_i32 = arith.constant 0 : i32
    %c0_i32_0 = arith.constant 0 : i32
    return %arg1, %arg0, %c0_i32 : i32, i32, i32
  }
  func.func @transform_4(%arg0: i32, %arg1: i32, %arg2: i32) -> (i32, i32, i32) {
    %c0_i32 = arith.constant 0 : i32
    %c0_i32_0 = arith.constant 0 : i32
    return %arg1, %arg0, %c0_i32 : i32, i32, i32
  }
}

</mosaic_0001>

<bundles_post_ra>
// kernel: tpu_custom_call.1
= control target key start
LH: loop header
LB: loop body
LE: loop exit
PB: predicated region body
PF: predicated region fallthrough
CT: control target
= control target key end

     0   :  { %10 = vsyncpa [#allocation3], 0  ;;  %s281_s0 = inlined_call_operand.hbm [shape: f32[8,256], index: 0, kind: input, shape index: {}]   ;;  %s282_s1 = inlined_call_operand.hbm [shape: f32[8,256], index: 1, kind: input, shape index: {}]   ;;  %s283_s2 = inlined_call_operand.hbm [shape: f32[1,8,128], index: 2, kind: output, shape index: {0}]   ;;  %s284_s3 = inlined_call_operand.hbm [shape: f32[1,8,128], index: 3, kind: output, shape index: {1}]   ;;  %s285_s4 = inlined_call_operand.hbm [shape: f32[1,8,128], index: 4, kind: output, shape index: {2}]  }
   0x1   :  { %11 = vsyncpa [#allocation6], 0 }
   0x2   :  { %12 = vsyncpa [#allocation4], 0 }
   0x3   :  { %13 = vsyncpa [#allocation9], 0  ;;  %s236_s15 = smov [#allocation2]   ;;  %s237_s17 = smov [#allocation5]  }
   0x4   :  { %s24_s16 = sshll.u32 %s236_s15, 4  ;;  %s38_s18 = sshll.u32 %s237_s17, 4  ;;  %s25_s16 = int_to_ptr.vmem [resolvable:$true] %s24_s16  ;;  %s39_s18 = int_to_ptr.vmem [resolvable:$true] %s38_s18 }
   0x5   :  { %s136_s19 = scalar_lea.vmem %s25_s16, 256  ;;  %p141_p1 = scmp.lt.s32.totalorder %s25_s16, %s25_s16 }
   0x6   :  { %p137_p0 = scmp.ne.s32.totalorder %s25_s16, %s136_s19  ;;  %p142_p2 = scmp.lt.s32.totalorder %s136_s19, %s136_s19 }
   0x8   :  { %p143_p3 = por %p142_p2, %p141_p1 }
   0xa   :  { %p144_p4 = pnand %p143_p3, %p137_p0 }
   0xc   :  { %147 = shalt.err (!%p144_p4)
}
   0xd   :  { %27 = dma.hbm_to_vmem [thread:$0]  %s281_s0, 256, %s25_s16, [#allocation3]  }
   0xe   :  { %s156_s22 = scalar_lea.vmem %s39_s18, 256  ;;  %p161_p6 = scmp.lt.s32.totalorder %s39_s18, %s39_s18 }
   0xf   :  { %p157_p5 = scmp.ne.s32.totalorder %s39_s18, %s156_s22  ;;  %p162_p7 = scmp.lt.s32.totalorder %s156_s22, %s156_s22 }
  0x11   :  { %p163_p8 = por %p162_p7, %p161_p6 }
  0x13   :  { %p164_p9 = pnand %p163_p8, %p157_p5 }
  0x15   :  { %167 = shalt.err (!%p164_p9)
}
  0x16   :  { %41 = dma.hbm_to_vmem [thread:$0]  %s282_s1, 256, %s39_s18, [#allocation6]  }
  0x17   :  { %228 = dma.done.wait [#allocation3], 256  }
  0x18   :  { %229 = vsyncadd [#allocation3], 4294967040 }
  0x19   :  { %230 = dma.done.wait [#allocation6], 256  }
  0x1a   :  { %231 = vsyncadd [#allocation6], 4294967040  ;;  %v62_v0 = vld [vmem:[#allocation2] sm:$0xff]  ;;  %v69_v1 = vld [vmem:[#allocation2 + $0x8] sm:$0xff]  ;;  %s238_s25 = smov [#allocation8]   ;;  %s239_s26 = smov [#allocation10]  }
  0x1b   :  { %v63_v2 = vld [vmem:[#allocation5] sm:$0xff]  ;;  %s95_s0 = sshll.u32 %s238_s25, 4  ;;  %v71_v4 = vld [vmem:[#allocation5 + $0x8] sm:$0xff]  ;;  %s105_s27 = sshll.u32 %s239_s26, 4  ;;  %v74_v6 = vadd.f32 %v69_v1, %v62_v0  ;;  %s96_s0 = int_to_ptr.vmem [resolvable:$true] %s95_s0  ;;  %s106_s27 = int_to_ptr.vmem [resolvable:$true] %s105_s27 }
  0x1c   :  { %v64_v3 = vmul.f32 %v63_v2, %v62_v0  ;;  %v72_v5 = vmul.f32 %v71_v4, %v69_v1  ;;  %s240_s28 = smov [#allocation7]   ;;  %v75_v7 = vadd.f32 %v71_v4, %v63_v2  ;;  %s168_s1 = scalar_lea.vmem %s96_s0, 128 }
  0x1d   :  { %s85_s29 = sshll.u32 %s240_s28, 4  ;;  %77 = vst [vmem:[#allocation8] sm:$0xff] %v74_v6  ;;  %p169_p10 = scmp.ne.s32.totalorder %s96_s0, %s168_s1  ;;  %s86_s29 = int_to_ptr.vmem [resolvable:$true] %s85_s29 }
  0x1e   :  { %v73_v8 = vadd.f32 %v72_v5, %v64_v3  ;;  %78 = vst [vmem:[#allocation10] sm:$0xff] %v75_v7  ;;  %p173_p11 = scmp.lt.s32.totalorder %s96_s0, %s96_s0  ;;  %p174_p12 = scmp.lt.s32.totalorder %s168_s1, %s168_s1 }
  0x20   :  { %p175_p13 = por %p174_p12, %p173_p11 }
  0x22   :  { %p176_p0 = pnand %p175_p13, %p169_p10 }
  0x24   :  { %179 = shalt.err (!%p176_p0)
}
  0x25   :  { %98 = dma.vmem_to_hbm [thread:$0]  %s96_s0, 128, %s284_s3, [#allocation9]   ;;  %76 = vst [vmem:[#allocation7] sm:$0xff] %v73_v8 }
  0x26   :  { %s188_s6 = scalar_lea.vmem %s106_s27, 128  ;;  %p193_p2 = scmp.lt.s32.totalorder %s106_s27, %s106_s27 }
  0x27   :  { %p189_p1 = scmp.ne.s32.totalorder %s106_s27, %s188_s6  ;;  %p194_p3 = scmp.lt.s32.totalorder %s188_s6, %s188_s6 }
  0x29   :  { %p195_p4 = por %p194_p3, %p193_p2 }
  0x2b   :  { %p196_p5 = pnand %p195_p4, %p189_p1 }
  0x2d   :  { %199 = shalt.err (!%p196_p5)
}
  0x2e   :  { %108 = dma.vmem_to_hbm [thread:$0]  %s106_s27, 128, %s285_s4, [#allocation9]  }
  0x2f   :  { %s208_s9 = scalar_lea.vmem %s86_s29, 128  ;;  %p213_p7 = scmp.lt.s32.totalorder %s86_s29, %s86_s29 }
  0x30   :  { %p209_p6 = scmp.ne.s32.totalorder %s86_s29, %s208_s9  ;;  %p214_p8 = scmp.lt.s32.totalorder %s208_s9, %s208_s9 }
  0x32   :  { %p215_p9 = por %p214_p8, %p213_p7 }
  0x34   :  { %p216_p10 = pnand %p215_p9, %p209_p6 }
  0x36   :  { %219 = shalt.err (!%p216_p10)
}
  0x37   :  { %88 = dma.vmem_to_hbm [thread:$0]  %s86_s29, 128, %s283_s2, [#allocation4]  }
  0x38   :  { %232 = dma.done.wait [#allocation4], 128  }
  0x39   :  { %233 = vsyncadd [#allocation4], 4294967168 }
  0x3a   :  { %234 = dma.done.wait [#allocation9], 256  }
  0x3b   :  { %235 = vsyncadd [#allocation9], 4294967040 }
  0x3c   :  { %118 = vsyncpa [#allocation3], 1 }
  0x3d   :  { %119 = vsyncpa [#allocation6], 1 }
  0x3e   :  { %120 = vsyncpa [#allocation4], 1 }
  0x3f   :  { %121 = vsyncpa [#allocation9], 1 }

</bundles_post_ra>
